<compile_context>
chip_gen: v7x
topology: tpu7x:2x2x1
jax: 0.10.0
libtpu: 0.0.40
codegen_flags: <defaults>
</compile_context>

<pallas_src>
import functools

import jax
import jax.numpy as jnp
from jax import lax
from jax.experimental import pallas as pl
from jax.experimental.pallas import tpu as pltpu


_TR_MAX = 512                       # max row-tile (sublane axis)
_TILE_BYTES = 8 * 1024 * 1024       # target bytes per input buffer
_VMEM_LIMIT = 48 * 1024 * 1024      # scoped VMEM ceiling (safe on v5e/v6e/v7x)


def _round_up(x: int, m: int) -> int:
    return ((x + m - 1) // m) * m


def _sublane_unit(dtype) -> int:
    # second-to-last-dim tiling unit by element width (f32: 8, bf16: 16, int8: 32)
    return {4: 8, 2: 16, 1: 32}.get(jnp.dtype(dtype).itemsize, 8)


def _gap_single_kernel(x_ref, o_ref, *, inv_hw: float):
    """Whole HW fits in one block: (TR, HW) -> (TR, 1) in one shot."""
    xf = x_ref[...].astype(jnp.float32)
    row_sum = jnp.sum(xf, axis=-1, keepdims=True)       # one XLU reduce per tile
    o_ref[...] = (row_sum * inv_hw).astype(o_ref.dtype)


def _gap_multi_kernel(x_ref, o_ref, acc_ref, *, hw: int, tk: int,
                      inv_hw: float, need_mask: bool):
    """Multi-tile HW reduction.

    x_ref:   (TR, TK) input tile for reduction step k
    o_ref:   (TR, 1)  output block (resident across the k axis)
    acc_ref: (TR, 128) f32 lane-parallel partial sums
    """
    k = pl.program_id(1)

    @pl.when(k == 0)
    def _():
        acc_ref[...] = jnp.zeros_like(acc_ref)

    tr = x_ref.shape[0]
    n_chunks = tk // 128
    if need_mask:
        # Hoisted lane-index iota; per-chunk mask is iota + scalar < HW.
        lane = lax.broadcasted_iota(jnp.int32, (tr, 128), 1)
        base = k * tk  # global HW offset of this tile (traced scalar)

    # Fold TK lanes down to 128 with aligned, elementwise VPU adds (no
    # per-step cross-lane reduce).  Ragged lanes of the final tile are zeroed.
    partial = acc_ref[...]
    for g in range(n_chunks):
        chunk = x_ref[:, g * 128:(g + 1) * 128].astype(jnp.float32)
        if need_mask:
            chunk = jnp.where(lane + (base + g * 128) < hw, chunk, 0.0)
        partial = partial + chunk
    acc_ref[...] = partial

    @pl.when(k == pl.num_programs(1) - 1)
    def _():
        row_sum = jnp.sum(acc_ref[...], axis=-1, keepdims=True)  # single XLU reduce
        o_ref[...] = (row_sum * inv_hw).astype(o_ref.dtype)


def global_average_pooling(x, *, tile_bytes: int = _TILE_BYTES):
    """x: (N, C, H, W) -> (N, C); mean over spatial dims (torch.mean(dim=2))."""
    n, c, h, w = x.shape
    rows, hw = n * c, h * w
    dtype = x.dtype
    itemsize = jnp.dtype(dtype).itemsize
    sub = _sublane_unit(dtype)

    # Row tile: multiple of the sublane unit, capped at _TR_MAX.
    tr = min(_TR_MAX, _round_up(rows, sub))
    row_tiles = pl.cdiv(rows, tr)

    # HW tile width from the byte budget (multiple of 128 lanes).
    tk_budget = max(128, (tile_bytes // (tr * itemsize)) // 128 * 128)

    inv_hw = 1.0 / float(hw)
    x2d = x.reshape(rows, hw)  # free view; no padded HBM copy

    out_shape = jax.ShapeDtypeStruct((rows, 1), dtype)
    cost = pl.CostEstimate(
        flops=rows * hw,
        transcendentals=0,
        bytes_accessed=rows * hw * itemsize + rows * itemsize,
    )

    if hw <= tk_budget:
        # ---- Single-HW-tile path: no reduction grid axis, no scratch. ----
        out = pl.pallas_call(
            functools.partial(_gap_single_kernel, inv_hw=inv_hw),
            out_shape=out_shape,
            grid_spec=pltpu.PrefetchScalarGridSpec(
                num_scalar_prefetch=0,
                grid=(row_tiles,),
                in_specs=[pl.BlockSpec((tr, hw), lambda i: (i, 0))],
                out_specs=pl.BlockSpec((tr, 1), lambda i: (i, 0)),
            ),
            compiler_params=pltpu.CompilerParams(
                dimension_semantics=("parallel",),
                vmem_limit_bytes=_VMEM_LIMIT,
            ),
            cost_estimate=cost,
        )(x2d)
    else:
        # ---- Tiled reduction over HW (reduction axis last). ----
        tk = tk_budget
        hw_tiles = pl.cdiv(hw, tk)
        need_mask = (hw % tk) != 0
        out = pl.pallas_call(
            functools.partial(_gap_multi_kernel, hw=hw, tk=tk,
                              inv_hw=inv_hw, need_mask=need_mask),
            out_shape=out_shape,
            grid_spec=pltpu.PrefetchScalarGridSpec(
                num_scalar_prefetch=0,
                grid=(row_tiles, hw_tiles),
                in_specs=[pl.BlockSpec((tr, tk), lambda i, k: (i, k))],
                out_specs=pl.BlockSpec((tr, 1), lambda i, k: (i, 0)),
                scratch_shapes=[pltpu.VMEM((tr, 128), jnp.float32)],
            ),
            compiler_params=pltpu.CompilerParams(
                dimension_semantics=("parallel", "arbitrary"),
                vmem_limit_bytes=_VMEM_LIMIT,
            ),
            cost_estimate=cost,
        )(x2d)

    return out[:, 0].reshape(n, c)


if __name__ == "__main__":
    key = jax.random.PRNGKey(0)

    # Primary shape from the module spec (single-HW-tile fast path).
    x = jax.random.normal(key, (2, 4, 16, 16), dtype=jnp.float32)
    y = global_average_pooling(x)
    jax.block_until_ready(y)
    y_ref = jnp.mean(x.reshape(2, 4, -1), axis=2)
    assert y.shape == (2, 4)
    assert jnp.allclose(y, y_ref, atol=1e-5, rtol=1e-5)

    # Small shape with a deliberately tiny tile budget to exercise the
    # multi-HW-tile path with a ragged, masked final tile (hw=400, tk=128).
    x2 = jax.random.normal(jax.random.PRNGKey(0), (2, 4, 20, 20),
                           dtype=jnp.float32)
    y2 = global_average_pooling(x2, tile_bytes=4096)
    jax.block_until_ready(y2)
    y2_ref = jnp.mean(x2.reshape(2, 4, -1), axis=2)
    assert jnp.allclose(y2, y2_ref, atol=1e-5, rtol=1e-5)

    print("KERNEL_OK")
</pallas_src>

<mosaic_0001>
module attributes {stable_mosaic.version = 11 : i64} {
  func.func @_gap_single_kernel(%arg0: i32, %arg1: memref<8x256xf32, #tpu.memory_space<vmem>>, %arg2: memref<8x1xf32, #tpu.memory_space<vmem>>) attributes {dimension_semantics = [#tpu.dimension_semantics<parallel>], iteration_bounds = array<i64: 1>, scalar_prefetch = 0 : i64, scratch_operands = 0 : i64, tpu.core_type = #tpu.core_type<tc>, window_params = [{transform_indices = @transform_0, window_bounds = array<i64: 8, 256>}, {transform_indices = @transform_1, window_bounds = array<i64: 8, 1>}]} {
    %c0 = arith.constant 0 : index
    %c0_0 = arith.constant 0 : index
    %0 = vector.load %arg1[%c0, %c0_0] : memref<8x256xf32, #tpu.memory_space<vmem>>, vector<8x256xf32>
    %cst = arith.constant dense<0.000000e+00> : vector<8xf32>
    %1 = vector.multi_reduction <add>, %0, %cst [1] : vector<8x256xf32> to vector<8xf32>
    %2 = vector.shape_cast %1 : vector<8xf32> to vector<8x1xf32>
    %cst_1 = arith.constant 3.906250e-03 : f32
    %3 = vector.broadcast %cst_1 : f32 to vector<8x1xf32>
    %4 = arith.mulf %2, %3 : vector<8x1xf32>
    %c0_2 = arith.constant 0 : index
    %c0_3 = arith.constant 0 : index
    %5 = vector.load %arg2[%c0_2, %c0_3] : memref<8x1xf32, #tpu.memory_space<vmem>>, vector<8x1xf32>
    tpu.vector_store %arg2[%c0_2, %c0_3], %4 {strides = array<i32>} : memref<8x1xf32, #tpu.memory_space<vmem>>, vector<8x1xf32>,
    return
  }
  func.func @transform_0(%arg0: i32) -> (i32, i32) {
    %c0_i32 = arith.constant 0 : i32
    %c0_i32_0 = arith.constant 0 : i32
    return %arg0, %c0_i32 : i32, i32
  }
  func.func @transform_1(%arg0: i32) -> (i32, i32) {
    %c0_i32 = arith.constant 0 : i32
    %c0_i32_0 = arith.constant 0 : i32
    return %arg0, %c0_i32 : i32, i32
  }
}

</mosaic_0001>

<bundles_post_ra>
// kernel: tpu_custom_call.1
= control target key start
LH: loop header
LB: loop body
LE: loop exit
PB: predicated region body
PF: predicated region fallthrough
CT: control target
= control target key end

     0   :  { %6 = vsyncpa [#allocation3], 0  ;;  %s58_s6 = smov [#allocation2]   ;;  %s84_s0 = inlined_call_operand.hbm [shape: f32[8,256], index: 0, kind: input, shape index: {}]   ;;  %s85_s1 = inlined_call_operand.vmem [shape: f32[8,1], index: 1, kind: output, shape index: {}]  }
   0x1   :  { %s13_s7 = sshll.u32 %s58_s6, 4  ;;  %s34_s10 = scalar_lea.hbm %s84_s0, 256  ;;  %s14_s7 = int_to_ptr.vmem [resolvable:$true] %s13_s7 }
   0x2   :  { %p35_p0 = scmp.ne.s32.totalorder %s84_s0, %s34_s10  ;;  %p38_p1 = scmp.lt.u32.totalorder %s34_s10, %s84_s0 }
   0x4   :  { %p40_p2 = pnand %p38_p1, %p35_p0 }
   0x6   :  { %43 = shalt.err (!%p40_p2)
}
   0x7   :  { %s44_s15 = scalar_lea.vmem %s14_s7, 256  ;;  %p49_p4 = scmp.lt.s32.totalorder %s14_s7, %s14_s7 }
   0x8   :  { %p45_p3 = scmp.ne.s32.totalorder %s14_s7, %s44_s15  ;;  %p50_p5 = scmp.lt.s32.totalorder %s44_s15, %s44_s15 }
   0xa   :  { %p51_p6 = por %p50_p5, %p49_p4 }
   0xc   :  { %p52_p7 = pnand %p51_p6, %p45_p3 }
   0xe   :  { %55 = shalt.err (!%p52_p7)
}
   0xf   :  { %16 = dma.hbm_to_vmem [thread:$0]  %s84_s0, 256, %s14_s7, [#allocation3]  }
  0x10   :  { %56 = dma.done.wait [#allocation3], 256  }
  0x11   :  { %57 = vsyncadd [#allocation3], 4294967040  ;;  %v20_v0 = vld [vmem:[#allocation2] sm:$0xff]  ;;  %v21_v1 = vld [vmem:[#allocation2 + $0x8] sm:$0xff]  ;;  %vm26_vm0 = vcmask 7168  }
  0x12   :  { %v22_v2 = vadd.f32 %v21_v1, %v20_v0 }
  0x14   :  { %23 = vadd.xlane.f32.xlu0 %v22_v2 }
  0xa1   :  { %v24_v3 = vpop.xlane.xlu0 %23 }
  0xa2   :  { %v25_v4 = vmul.f32 0.00390625, %v24_v3 }
  0xa4   :  { %27 = vst.msk [vmem:[%s85_s1] sm:$0xff] %vm26_vm0, %v25_v4 }
  0xa5   :  { %32 = vsyncpa [#allocation3], 1 }

</bundles_post_ra>
